<compile_context>
chip_gen: v7x
topology: tpu7x:2x2x1
jax: 0.10.0
libtpu: 0.0.40
codegen_flags: <defaults>
</compile_context>

<pallas_src>
import numpy as np
import jax
import jax.numpy as jnp
from jax.experimental import pallas as pl
from jax.experimental.pallas import tpu as pltpu

NUM_JOINTS = 24
P_DIM = (NUM_JOINTS - 1) * 9   # 207 pose-blend features
PK = 256                       # P_DIM padded to a lane multiple (matmul K dimension)
TB = 8                         # batch tile = one full sublane group

# SMPL kinematic tree (parent of each of the 24 joints)
PARENTS = np.array(
    [-1, 0, 0, 0, 1, 2, 3, 4, 5, 6, 7, 8, 9, 9, 9, 12, 13, 14, 16, 17, 18, 19, 20, 21],
    dtype=np.int32,
)


# ----------------------------------------------------------------------------- glue
def rotation_6d_to_matrix(d6):
    """pytorch3d.transforms.rotation_6d_to_matrix semantics. d6: (..., 6) -> (..., 3, 3)."""
    a1, a2 = d6[..., :3], d6[..., 3:]
    b1 = a1 / jnp.linalg.norm(a1, axis=-1, keepdims=True)
    b2 = a2 - jnp.sum(b1 * a2, axis=-1, keepdims=True) * b1
    b2 = b2 / jnp.linalg.norm(b2, axis=-1, keepdims=True)
    b3 = jnp.cross(b1, b2)
    return jnp.stack((b1, b2, b3), axis=-2)


def batch_rigid_transform(rot_mats, joints, parents):
    """smplx.lbs.batch_rigid_transform. rot_mats: (B,24,3,3), joints: (B,24,3)."""
    B, J = joints.shape[:2]
    rel_joints = joints.at[:, 1:].add(-joints[:, parents[1:]])
    tm = jnp.concatenate([rot_mats, rel_joints[..., None]], axis=-1)          # (B,J,3,4)
    bottom = jnp.broadcast_to(
        jnp.array([0.0, 0.0, 0.0, 1.0], jnp.float32), (B, J, 1, 4))
    tm = jnp.concatenate([tm, bottom], axis=-2)                               # (B,J,4,4)

    chain = [tm[:, 0]]
    for i in range(1, J):
        chain.append(chain[int(parents[i])] @ tm[:, i])
    transforms = jnp.stack(chain, axis=1)                                     # (B,J,4,4)

    posed_joints = transforms[:, :, :3, 3]
    r_times_j = (transforms[:, :, :3, :3] @ joints[..., None])[..., 0]        # (B,J,3)
    rel_transforms = transforms.at[:, :, :3, 3].add(-r_times_j)
    return posed_joints, rel_transforms


# ---------------------------------------------------------------------- Pallas kernel
def lbs_kernel(pf_ref, pd_ref, vt_ref, wT_ref, a_ref, out_ref):
    """
    One batch tile of TB elements per grid step.
      pf_ref : (TB, PK)          bf16  pose features (R_j - I, joints 1..23), zero padded
      pd_ref : (PK, 3*V)         bf16  pose blend-shape dirs, coord-blocked along lanes
      vt_ref : (3, V)            f32   template vertices, coordinate-major
      wT_ref : (24, V)           f32   skinning weights, transposed
      a_ref  : (1, 16*TB, 24)    f32   rel. transforms; row k*TB + t = flat-index k of batch t
      out_ref: (3, TB, V)        f32   skinned vertices, coordinate-major
    """
    V = vt_ref.shape[1]

    # pose blend-shape offsets: one (TB, PK) @ (PK, 3V) bf16 MXU matmul, f32 accumulate
    off = jnp.dot(pf_ref[...], pd_ref[...],
                  preferred_element_type=jnp.float32)                # (TB, 3V)
    vx = vt_ref[0:1, :] + off[:, 0:V]                                # (TB, V)
    vy = vt_ref[1:2, :] + off[:, V:2 * V]
    vz = vt_ref[2:3, :] + off[:, 2 * V:3 * V]

    # blended per-vertex transforms: one (16*TB, 24) @ (24, V) MXU matmul for the tile
    tt = jnp.dot(a_ref[0], wT_ref[...],
                 preferred_element_type=jnp.float32)                 # (16*TB, V)

    # per-vertex affine transform: full-sublane (TB, V) VPU ops, direct row writes
    for i in range(3):  # static unroll over output coordinates
        tx = tt[(4 * i + 0) * TB:(4 * i + 1) * TB, :]
        ty = tt[(4 * i + 1) * TB:(4 * i + 2) * TB, :]
        tz = tt[(4 * i + 2) * TB:(4 * i + 3) * TB, :]
        tw = tt[(4 * i + 3) * TB:(4 * i + 4) * TB, :]
        out_ref[i] = tx * vx + ty * vy + tz * vz + tw


def lbs_pallas(pf, posedirs_b, v_template_r, lbs_weights_T, a_r):
    Bp = pf.shape[0]
    V = v_template_r.shape[-1]
    nb = Bp // TB

    flops = (2 * Bp * PK * 3 * V          # pose blend-shape matmul
             + 2 * Bp * 16 * NUM_JOINTS * V   # skinning matmul
             + 7 * 3 * Bp * V)                # per-vertex blend
    bytes_accessed = (pf.size * 2 + posedirs_b.size * 2 + v_template_r.size * 4
                      + lbs_weights_T.size * 4 + a_r.size * 4 + 3 * Bp * V * 4)

    grid_spec = pltpu.PrefetchScalarGridSpec(
        num_scalar_prefetch=0,
        grid=(nb,),
        in_specs=[
            pl.BlockSpec((TB, PK), lambda b: (b, 0)),
            # The next three inputs are grid-invariant (constant index_map).
            # TODO(synk): at real SMPL size (V=6890 -> pad 6912) tile V on a second
            # 'parallel' grid axis and single-buffer these invariants so the working
            # set fits v7x's 64 MiB VMEM.
            pl.BlockSpec((PK, 3 * V), lambda b: (0, 0)),
            pl.BlockSpec((3, V), lambda b: (0, 0)),
            pl.BlockSpec((NUM_JOINTS, V), lambda b: (0, 0)),
            pl.BlockSpec((1, 16 * TB, NUM_JOINTS), lambda b: (b, 0, 0)),
        ],
        out_specs=pl.BlockSpec((3, TB, V), lambda b: (0, b, 0)),
    )
    return pl.pallas_call(
        lbs_kernel,
        out_shape=jax.ShapeDtypeStruct((3, Bp, V), jnp.float32),
        grid_spec=grid_spec,
        compiler_params=pltpu.CompilerParams(dimension_semantics=("parallel",)),
        cost_estimate=pl.CostEstimate(flops=int(flops), transcendentals=0,
                                      bytes_accessed=int(bytes_accessed)),
    )(pf, posedirs_b, v_template_r, lbs_weights_T, a_r)


# ------------------------------------------------------------------- full forward
def smpl_forward(batch, params):
    """Equivalent of SMPLModel.forward(batch) (rotation_and_transl=False)."""
    if batch.shape[-2] != NUM_JOINTS:
        raise ValueError(f"The poses should have 24 joints, got shape {batch.shape}")
    B = batch.shape[0]
    eye = jnp.eye(3, dtype=jnp.float32)

    rot = rotation_6d_to_matrix(batch)                               # (B, 24, 3, 3)
    # global_orient is replaced by identity (module discards root rotation)
    rot_mats = jnp.concatenate(
        [jnp.broadcast_to(eye, (B, 1, 3, 3)), rot[:, 1:]], axis=1)

    pose_feature = (rot_mats[:, 1:] - eye).reshape(B, P_DIM)         # (B, 207)

    # rest joints (betas = 0  ->  v_shaped = v_template)
    J_rest = params["J_regressor"] @ params["v_template"]            # (24, 3)
    J_rest = jnp.broadcast_to(J_rest, (B, NUM_JOINTS, 3))
    posed_joints, A = batch_rigid_transform(rot_mats, J_rest, PARENTS)

    # fold B into the matmul M-dimension: pad batch to a multiple of TB
    Bp = ((B + TB - 1) // TB) * TB
    nb = Bp // TB
    pad = Bp - B
    pf = jnp.pad(pose_feature, ((0, pad), (0, PK - P_DIM))).astype(jnp.bfloat16)  # (Bp,PK)

    A16 = jnp.pad(A.reshape(B, NUM_JOINTS, 16), ((0, pad), (0, 0), (0, 0)))  # (Bp,24,16)
    a_r = (A16.reshape(nb, TB, NUM_JOINTS, 16)
              .transpose(0, 3, 1, 2)                                 # (nb, 16, TB, 24)
              .reshape(nb, 16 * TB, NUM_JOINTS))                     # rows: k-major, t-minor

    verts_r = lbs_pallas(pf, params["posedirs_b"], params["v_template_r"],
                         params["lbs_weights_T"], a_r)               # (3, Bp, V)
    verts = verts_r[:, :B, :].transpose(1, 2, 0)                     # (B, V, 3)
    V = verts.shape[1]

    # TODO(synk): smplx additionally appends extra vertex keypoints via
    # VertexJointSelector (-> 45 joints); synthetic model returns the 24 posed joints.
    joints = posed_joints                                            # (B, 24, 3)

    return verts.reshape(B, 1, V, 3), joints.reshape(B, 1, NUM_JOINTS, 3)


# ------------------------------------------------------------- pure-JAX reference
def smpl_forward_reference(batch, params):
    B = batch.shape[0]
    eye = jnp.eye(3, dtype=jnp.float32)
    rot = rotation_6d_to_matrix(batch)
    rot_mats = jnp.concatenate([jnp.broadcast_to(eye, (B, 1, 3, 3)), rot[:, 1:]], axis=1)
    pose_feature = (rot_mats[:, 1:] - eye).reshape(B, P_DIM)
    V = params["v_template"].shape[0]
    pose_offsets = (pose_feature @ params["posedirs"]).reshape(B, V, 3)
    v_posed = params["v_template"][None] + pose_offsets
    J_rest = jnp.broadcast_to(params["J_regressor"] @ params["v_template"],
                              (B, NUM_JOINTS, 3))
    posed_joints, A = batch_rigid_transform(rot_mats, J_rest, PARENTS)
    T = jnp.einsum("vj,bjk->bvk", params["lbs_weights"],
                   A.reshape(B, NUM_JOINTS, 16)).reshape(B, V, 4, 4)
    vh = jnp.concatenate([v_posed, jnp.ones((B, V, 1), jnp.float32)], axis=-1)
    verts = jnp.einsum("bvij,bvj->bvi", T, vh)[..., :3]
    return verts.reshape(B, 1, V, 3), posed_joints.reshape(B, 1, NUM_JOINTS, 3)


def make_params(key, num_vertices=256):
    k1, k2, k3, k4 = jax.random.split(key, 4)
    V = num_vertices
    v_template = jax.random.normal(k1, (V, 3), jnp.float32) * 0.3
    J_regressor = jax.nn.softmax(jax.random.normal(k2, (NUM_JOINTS, V), jnp.float32), axis=-1)
    posedirs = jax.random.normal(k3, (P_DIM, V * 3), jnp.float32) * 0.01
    lbs_weights = jax.nn.softmax(jax.random.normal(k4, (V, NUM_JOINTS), jnp.float32) * 2.0, axis=-1)

    # kernel-friendly layouts:
    #   posedirs_b : (PK, 3V) bf16, coordinate blocks [x|y|z] along lanes, K zero-padded
    #   v_template_r : (3, V) f32 coordinate-major
    #   lbs_weights_T : (24, V) f32 transposed
    posedirs_cb = posedirs.reshape(P_DIM, V, 3).transpose(0, 2, 1).reshape(P_DIM, 3 * V)
    posedirs_b = jnp.pad(posedirs_cb, ((0, PK - P_DIM), (0, 0))).astype(jnp.bfloat16)
    return {
        "v_template": v_template,
        "J_regressor": J_regressor,
        "posedirs": posedirs,
        "lbs_weights": lbs_weights,
        "posedirs_b": posedirs_b,
        "v_template_r": v_template.T,
        "lbs_weights_T": lbs_weights.T,
    }


if __name__ == "__main__":
    key = jax.random.PRNGKey(0)
    k_params, k_batch = jax.random.split(key)

    params = make_params(k_params, num_vertices=256)
    B = 2
    batch = jax.random.normal(k_batch, (B, NUM_JOINTS, 6), jnp.float32)

    verts, joints = smpl_forward(batch, params)
    verts = jax.block_until_ready(verts)
    joints = jax.block_until_ready(joints)

    verts_ref, joints_ref = smpl_forward_reference(batch, params)
    assert verts.shape == (B, 1, 256, 3) and joints.shape == (B, 1, NUM_JOINTS, 3)
    # verts tolerance covers bf16 quantization of the pose-blendshape path (~1e-3 scale)
    assert np.allclose(np.asarray(verts), np.asarray(verts_ref), atol=1e-2, rtol=1e-2)
    assert np.allclose(np.asarray(joints), np.asarray(joints_ref), atol=1e-4, rtol=1e-4)

    print("KERNEL_OK")
</pallas_src>

<mosaic_0001>
module attributes {stable_mosaic.version = 11 : i64} {
  func.func @lbs_kernel(%arg0: i32, %arg1: memref<8x256xbf16, #tpu.memory_space<vmem>>, %arg2: memref<256x768xbf16, #tpu.memory_space<vmem>>, %arg3: memref<3x256xf32, #tpu.memory_space<vmem>>, %arg4: memref<24x256xf32, #tpu.memory_space<vmem>>, %arg5: memref<1x128x24xf32, #tpu.memory_space<vmem>>, %arg6: memref<3x8x256xf32, #tpu.memory_space<vmem>>) attributes {dimension_semantics = [#tpu.dimension_semantics<parallel>], iteration_bounds = array<i64: 1>, scalar_prefetch = 0 : i64, scratch_operands = 0 : i64, tpu.core_type = #tpu.core_type<tc>, window_params = [{transform_indices = @transform_0, window_bounds = array<i64: 8, 256>}, {pipeline_mode = #tpu.pipeline_mode<synchronous>, transform_indices = @transform_1, window_bounds = array<i64: 256, 768>}, {pipeline_mode = #tpu.pipeline_mode<synchronous>, transform_indices = @transform_2, window_bounds = array<i64: 3, 256>}, {pipeline_mode = #tpu.pipeline_mode<synchronous>, transform_indices = @transform_3, window_bounds = array<i64: 24, 256>}, {transform_indices = @transform_4, window_bounds = array<i64: 1, 128, 24>}, {transform_indices = @transform_5, window_bounds = array<i64: 3, 8, 256>}]} {
    %c0 = arith.constant 0 : index
    %c0_0 = arith.constant 0 : index
    %0 = vector.load %arg1[%c0, %c0_0] : memref<8x256xbf16, #tpu.memory_space<vmem>>, vector<8x256xbf16>
    %c0_1 = arith.constant 0 : index
    %c0_2 = arith.constant 0 : index
    %1 = vector.load %arg2[%c0_1, %c0_2] : memref<256x768xbf16, #tpu.memory_space<vmem>>, vector<256x768xbf16>
    %cst = arith.constant dense<0.000000e+00> : vector<8x768xf32>
    %2 = tpu.matmul %0, %1, %cst {dimension_numbers = #tpu.dot_dimension_numbers<[1], [0], [0], [1], [0, 0, 1, 1], [], []>} : vector<8x256xbf16>, vector<256x768xbf16>, vector<8x768xf32> -> vector<8x768xf32>
    %c0_3 = arith.constant 0 : index
    %c0_4 = arith.constant 0 : index
    %3 = vector.load %arg3[%c0_3, %c0_4] : memref<3x256xf32, #tpu.memory_space<vmem>>, vector<1x256xf32>
    %4 = vector.extract_strided_slice %2 {offsets = [0, 0], sizes = [8, 256], strides = [1, 1]} : vector<8x768xf32> to vector<8x256xf32>
    %5 = vector.broadcast %3 : vector<1x256xf32> to vector<8x256xf32>
    %6 = arith.addf %5, %4 : vector<8x256xf32>
    %c1 = arith.constant 1 : index
    %c0_5 = arith.constant 0 : index
    %7 = vector.load %arg3[%c1, %c0_5] : memref<3x256xf32, #tpu.memory_space<vmem>>, vector<1x256xf32>
    %8 = vector.extract_strided_slice %2 {offsets = [0, 256], sizes = [8, 256], strides = [1, 1]} : vector<8x768xf32> to vector<8x256xf32>
    %9 = vector.broadcast %7 : vector<1x256xf32> to vector<8x256xf32>
    %10 = arith.addf %9, %8 : vector<8x256xf32>
    %c2 = arith.constant 2 : index
    %c0_6 = arith.constant 0 : index
    %11 = vector.load %arg3[%c2, %c0_6] : memref<3x256xf32, #tpu.memory_space<vmem>>, vector<1x256xf32>
    %12 = vector.extract_strided_slice %2 {offsets = [0, 512], sizes = [8, 256], strides = [1, 1]} : vector<8x768xf32> to vector<8x256xf32>
    %13 = vector.broadcast %11 : vector<1x256xf32> to vector<8x256xf32>
    %14 = arith.addf %13, %12 : vector<8x256xf32>
    %c0_7 = arith.constant 0 : index
    %c0_8 = arith.constant 0 : index
    %c0_9 = arith.constant 0 : index
    %15 = vector.load %arg5[%c0_7, %c0_8, %c0_9] : memref<1x128x24xf32, #tpu.memory_space<vmem>>, vector<1x128x24xf32>
    %16 = vector.shape_cast %15 : vector<1x128x24xf32> to vector<128x24xf32>
    %c0_10 = arith.constant 0 : index
    %c0_11 = arith.constant 0 : index
    %17 = vector.load %arg4[%c0_10, %c0_11] : memref<24x256xf32, #tpu.memory_space<vmem>>, vector<24x256xf32>
    %cst_12 = arith.constant dense<0.000000e+00> : vector<128x256xf32>
    %18 = tpu.matmul %16, %17, %cst_12 {dimension_numbers = #tpu.dot_dimension_numbers<[1], [0], [0], [1], [0, 0, 1, 1], [], []>} : vector<128x24xf32>, vector<24x256xf32>, vector<128x256xf32> -> vector<128x256xf32>
    %19 = vector.extract_strided_slice %18 {offsets = [0, 0], sizes = [8, 256], strides = [1, 1]} : vector<128x256xf32> to vector<8x256xf32>
    %20 = vector.extract_strided_slice %18 {offsets = [8, 0], sizes = [8, 256], strides = [1, 1]} : vector<128x256xf32> to vector<8x256xf32>
    %21 = vector.extract_strided_slice %18 {offsets = [16, 0], sizes = [8, 256], strides = [1, 1]} : vector<128x256xf32> to vector<8x256xf32>
    %22 = vector.extract_strided_slice %18 {offsets = [24, 0], sizes = [8, 256], strides = [1, 1]} : vector<128x256xf32> to vector<8x256xf32>
    %23 = arith.mulf %19, %6 : vector<8x256xf32>
    %24 = arith.mulf %20, %10 : vector<8x256xf32>
    %25 = arith.addf %23, %24 : vector<8x256xf32>
    %26 = arith.mulf %21, %14 : vector<8x256xf32>
    %27 = arith.addf %25, %26 : vector<8x256xf32>
    %28 = arith.addf %27, %22 : vector<8x256xf32>
    %c0_13 = arith.constant 0 : index
    %c0_14 = arith.constant 0 : index
    %c0_15 = arith.constant 0 : index
    %29 = vector.load %arg6[%c0_13, %c0_14, %c0_15] : memref<3x8x256xf32, #tpu.memory_space<vmem>>, vector<1x8x256xf32>
    %30 = vector.shape_cast %29 : vector<1x8x256xf32> to vector<8x256xf32>
    %31 = vector.shape_cast %28 : vector<8x256xf32> to vector<1x8x256xf32>
    tpu.vector_store %arg6[%c0_13, %c0_14, %c0_15], %31 {strides = array<i32>} : memref<3x8x256xf32, #tpu.memory_space<vmem>>, vector<1x8x256xf32>,
    %32 = vector.extract_strided_slice %18 {offsets = [32, 0], sizes = [8, 256], strides = [1, 1]} : vector<128x256xf32> to vector<8x256xf32>
    %33 = vector.extract_strided_slice %18 {offsets = [40, 0], sizes = [8, 256], strides = [1, 1]} : vector<128x256xf32> to vector<8x256xf32>
    %34 = vector.extract_strided_slice %18 {offsets = [48, 0], sizes = [8, 256], strides = [1, 1]} : vector<128x256xf32> to vector<8x256xf32>
    %35 = vector.extract_strided_slice %18 {offsets = [56, 0], sizes = [8, 256], strides = [1, 1]} : vector<128x256xf32> to vector<8x256xf32>
    %36 = arith.mulf %32, %6 : vector<8x256xf32>
    %37 = arith.mulf %33, %10 : vector<8x256xf32>
    %38 = arith.addf %36, %37 : vector<8x256xf32>
    %39 = arith.mulf %34, %14 : vector<8x256xf32>
    %40 = arith.addf %38, %39 : vector<8x256xf32>
    %41 = arith.addf %40, %35 : vector<8x256xf32>
    %c1_16 = arith.constant 1 : index
    %c0_17 = arith.constant 0 : index
    %c0_18 = arith.constant 0 : index
    %42 = vector.load %arg6[%c1_16, %c0_17, %c0_18] : memref<3x8x256xf32, #tpu.memory_space<vmem>>, vector<1x8x256xf32>
    %43 = vector.shape_cast %42 : vector<1x8x256xf32> to vector<8x256xf32>
    %44 = vector.shape_cast %41 : vector<8x256xf32> to vector<1x8x256xf32>
    tpu.vector_store %arg6[%c1_16, %c0_17, %c0_18], %44 {strides = array<i32>} : memref<3x8x256xf32, #tpu.memory_space<vmem>>, vector<1x8x256xf32>,
    %45 = vector.extract_strided_slice %18 {offsets = [64, 0], sizes = [8, 256], strides = [1, 1]} : vector<128x256xf32> to vector<8x256xf32>
    %46 = vector.extract_strided_slice %18 {offsets = [72, 0], sizes = [8, 256], strides = [1, 1]} : vector<128x256xf32> to vector<8x256xf32>
    %47 = vector.extract_strided_slice %18 {offsets = [80, 0], sizes = [8, 256], strides = [1, 1]} : vector<128x256xf32> to vector<8x256xf32>
    %48 = vector.extract_strided_slice %18 {offsets = [88, 0], sizes = [8, 256], strides = [1, 1]} : vector<128x256xf32> to vector<8x256xf32>
    %49 = arith.mulf %45, %6 : vector<8x256xf32>
    %50 = arith.mulf %46, %10 : vector<8x256xf32>
    %51 = arith.addf %49, %50 : vector<8x256xf32>
    %52 = arith.mulf %47, %14 : vector<8x256xf32>
    %53 = arith.addf %51, %52 : vector<8x256xf32>
    %54 = arith.addf %53, %48 : vector<8x256xf32>
    %c2_19 = arith.constant 2 : index
    %c0_20 = arith.constant 0 : index
    %c0_21 = arith.constant 0 : index
    %55 = vector.load %arg6[%c2_19, %c0_20, %c0_21] : memref<3x8x256xf32, #tpu.memory_space<vmem>>, vector<1x8x256xf32>
    %56 = vector.shape_cast %55 : vector<1x8x256xf32> to vector<8x256xf32>
    %57 = vector.shape_cast %54 : vector<8x256xf32> to vector<1x8x256xf32>
    tpu.vector_store %arg6[%c2_19, %c0_20, %c0_21], %57 {strides = array<i32>} : memref<3x8x256xf32, #tpu.memory_space<vmem>>, vector<1x8x256xf32>,
    return
  }
  func.func @transform_0(%arg0: i32) -> (i32, i32) {
    %c0_i32 = arith.constant 0 : i32
    %c0_i32_0 = arith.constant 0 : i32
    return %arg0, %c0_i32 : i32, i32
  }
  func.func @transform_1(%arg0: i32) -> (i32, i32) {
    %c0_i32 = arith.constant 0 : i32
    %c0_i32_0 = arith.constant 0 : i32
    %c0_i32_1 = arith.constant 0 : i32
    return %c0_i32, %c0_i32_0 : i32, i32
  }
  func.func @transform_2(%arg0: i32) -> (i32, i32) {
    %c0_i32 = arith.constant 0 : i32
    %c0_i32_0 = arith.constant 0 : i32
    %c0_i32_1 = arith.constant 0 : i32
    return %c0_i32, %c0_i32_0 : i32, i32
  }
  func.func @transform_3(%arg0: i32) -> (i32, i32) {
    %c0_i32 = arith.constant 0 : i32
    %c0_i32_0 = arith.constant 0 : i32
    %c0_i32_1 = arith.constant 0 : i32
    return %c0_i32, %c0_i32_0 : i32, i32
  }
  func.func @transform_4(%arg0: i32) -> (i32, i32, i32) {
    %c0_i32 = arith.constant 0 : i32
    %c0_i32_0 = arith.constant 0 : i32
    %c0_i32_1 = arith.constant 0 : i32
    return %arg0, %c0_i32, %c0_i32_0 : i32, i32, i32
  }
  func.func @transform_5(%arg0: i32) -> (i32, i32, i32) {
    %c0_i32 = arith.constant 0 : i32
    %c0_i32_0 = arith.constant 0 : i32
    %c0_i32_1 = arith.constant 0 : i32
    return %c0_i32, %arg0, %c0_i32_0 : i32, i32, i32
  }
}

</mosaic_0001>

<bundles_post_ra>
// kernel: tpu_custom_call.1
= control target key start
LH: loop header
LB: loop body
LE: loop exit
PB: predicated region body
PF: predicated region fallthrough
CT: control target
= control target key end

     0   :  { %10 = vsyncpa [#allocation3], 0  ;;  %s1586_s0 = inlined_call_operand.vmem [shape: bf16[8,256], index: 0, kind: input, shape index: {}]   ;;  %s1587_s1 = inlined_call_operand.hbm [shape: bf16[256,768], index: 1, kind: input, shape index: {}]   ;;  %s1588_s2 = inlined_call_operand.vmem [shape: f32[3,256], index: 2, kind: input, shape index: {}]   ;;  %s1589_s3 = inlined_call_operand.vmem [shape: f32[24,256], index: 3, kind: input, shape index: {}]   ;;  %s1590_s4 = inlined_call_operand.vmem [shape: f32[1,128,24], index: 4, kind: input, shape index: {}]   ;;  %s1591_s5 = inlined_call_operand.hbm [shape: f32[3,8,256], index: 5, kind: output, shape index: {}]  }
   0x1   :  { %11 = vsyncpa [#allocation4], 0  ;;  %s1392_s18 = smov [#allocation2]   ;;  %s1344_s22 = scalar_lea.hbm %s1587_s1, 12288 }
   0x2   :  { %s19_s19 = sshll.u32 %s1392_s18, 4  ;;  %p1345_p0 = scmp.ne.s32.totalorder %s1587_s1, %s1344_s22  ;;  %s20_s19 = int_to_ptr.vmem [resolvable:$true] %s19_s19 }
   0x3   :  { %p1348_p1 = scmp.lt.u32.totalorder %s1344_s22, %s1587_s1 }
   0x5   :  { %p1350_p2 = pnand %p1348_p1, %p1345_p0 }
   0x7   :  { %1353 = shalt.err (!%p1350_p2)
}
   0x8   :  { %s1354_s27 = scalar_lea.vmem %s20_s19, 12288  ;;  %p1359_p4 = scmp.lt.s32.totalorder %s20_s19, %s20_s19 }
   0x9   :  { %p1355_p3 = scmp.ne.s32.totalorder %s20_s19, %s1354_s27  ;;  %p1360_p5 = scmp.lt.s32.totalorder %s1354_s27, %s1354_s27 }
   0xb   :  { %p1361_p6 = por %p1360_p5, %p1359_p4 }
   0xd   :  { %p1362_p7 = pnand %p1361_p6, %p1355_p3 }
   0xf   :  { %1365 = shalt.err (!%p1362_p7)
}
  0x10   :  { %s1393_s28 = smov 384   ;;  %s1394_s29 = smov 24  }
  0x11   :  { %25 = dma.hbm_to_vmem [thread:$0]  %s1587_s1, 12288, %s20_s19, [#allocation3], %s1393_s28, %s1393_s28, %s1394_s29  }
  0x12   :  { %1388 = dma.done.wait [#allocation3], 12288  }
  0x13   :  { %1389 = vsyncadd [#allocation3], 4294955008  ;;  %v1198_v0 = vld [vmem:[#allocation2 + $0x4] ss:$24 sps:$4 sm:$0xff]   ;;  %v1202_v2 = vld [vmem:[#allocation2] ss:$24 sps:$4 sm:$0xff]  }
  0x14   :  { %v1200_v1 = vld [vmem:[#allocation2 + $0xc] ss:$24 sps:$4 sm:$0xff]   ;;  %619 = vmatprep.subr.bf16.mxu0 %v1198_v0  ;;  %v1203_v3 = vld [vmem:[#allocation2 + $0x8] ss:$24 sps:$4 sm:$0xff]   ;;  %v1206_v5 = vld [vmem:[#allocation2 + $0x3c] ss:$24 sps:$4 sm:$0xff]  }
  0x15   :  { %660 = vmatprep.subr.bf16.mxu1 %v1200_v1  ;;  %v1204_v4 = vld [vmem:[#allocation2 + $0x34] ss:$24 sps:$4 sm:$0xff]   ;;  %620 = vmatpush1.bf16.msra.mxu0 %v1202_v2  ;;  %v1208_v6 = vld [vmem:[#allocation2 + $0x30] ss:$24 sps:$4 sm:$0xff]   ;;  %v1210_v8 = vld [vmem:[#allocation2 + $0x64] ss:$24 sps:$4 sm:$0xff]  }
  0x16   :  { %661 = vmatpush1.bf16.msra.mxu1 %v1203_v3  ;;  %621 = vmatprep.subr.bf16.mxu0 %v1204_v4  ;;  %v1209_v7 = vld [vmem:[#allocation2 + $0x38] ss:$24 sps:$4 sm:$0xff]   ;;  %v1212_v9 = vld [vmem:[#allocation2 + $0x6c] ss:$24 sps:$4 sm:$0xff]   ;;  %v1215_v11 = vld [vmem:[#allocation2 + $0x68] ss:$24 sps:$4 sm:$0xff]  }
  0x17   :  { %662 = vmatprep.subr.bf16.mxu1 %v1206_v5  ;;  %v1214_v10 = vld [vmem:[#allocation2 + $0x60] ss:$24 sps:$4 sm:$0xff]   ;;  %v1216_v12 = vld [vmem:[#allocation2 + $0x94] ss:$24 sps:$4 sm:$0xff]   ;;  %v1220_v14 = vld [vmem:[#allocation2 + $0x90] ss:$24 sps:$4 sm:$0xff]  }
  0x18   :  { %v1218_v13 = vld [vmem:[#allocation2 + $0x9c] ss:$24 sps:$4 sm:$0xff]   ;;  %v1221_v15 = vld [vmem:[#allocation2 + $0x98] ss:$24 sps:$4 sm:$0xff]   ;;  %v1224_v17 = vld [vmem:[#allocation2 + $0xcc] ss:$24 sps:$4 sm:$0xff]  }
  0x19   :  { %622 = vmatpush1.bf16.msra.mxu0 %v1208_v6  ;;  %v1222_v16 = vld [vmem:[#allocation2 + $0xc4] ss:$24 sps:$4 sm:$0xff]   ;;  %v1226_v18 = vld [vmem:[#allocation2 + $0xc0] ss:$24 sps:$4 sm:$0xff]   ;;  %v1228_v20 = vld [vmem:[#allocation2 + $0xf4] ss:$24 sps:$4 sm:$0xff]  }
  0x1a   :  { %663 = vmatpush1.bf16.msra.mxu1 %v1209_v7  ;;  %623 = vmatprep.subr.bf16.mxu0 %v1210_v8  ;;  %v1227_v19 = vld [vmem:[#allocation2 + $0xc8] ss:$24 sps:$4 sm:$0xff]   ;;  %v1230_v21 = vld [vmem:[#allocation2 + $0xfc] ss:$24 sps:$4 sm:$0xff]   ;;  %v1233_v23 = vld [vmem:[#allocation2 + $0xf8] ss:$24 sps:$4 sm:$0xff]  }
  0x1b   :  { %664 = vmatprep.subr.bf16.mxu1 %v1212_v9  ;;  %v1232_v22 = vld [vmem:[#allocation2 + $0xf0] ss:$24 sps:$4 sm:$0xff]   ;;  %v1234_v24 = vld [vmem:[#allocation2 + $0x124] ss:$24 sps:$4 sm:$0xff]   ;;  %v1238_v26 = vld [vmem:[#allocation2 + $0x120] ss:$24 sps:$4 sm:$0xff]  }
  0x1c   :  { %v1236_v25 = vld [vmem:[#allocation2 + $0x12c] ss:$24 sps:$4 sm:$0xff]   ;;  %v1239_v27 = vld [vmem:[#allocation2 + $0x128] ss:$24 sps:$4 sm:$0xff]   ;;  %v1242_v29 = vld [vmem:[#allocation2 + $0x15c] ss:$24 sps:$4 sm:$0xff]  }
  0x1d   :  { %624 = vmatpush1.bf16.msra.mxu0 %v1214_v10  ;;  %v1240_v28 = vld [vmem:[#allocation2 + $0x154] ss:$24 sps:$4 sm:$0xff]   ;;  %v1244_v30 = vld [vmem:[#allocation2 + $0x150] ss:$24 sps:$4 sm:$0xff]   ;;  %v1246_v32 = vld [vmem:[#allocation2 + $0x184] ss:$24 sps:$4 sm:$0xff]  }
  0x1e   :  { %665 = vmatpush1.bf16.msra.mxu1 %v1215_v11  ;;  %625 = vmatprep.subr.bf16.mxu0 %v1216_v12  ;;  %v1245_v31 = vld [vmem:[#allocation2 + $0x158] ss:$24 sps:$4 sm:$0xff]   ;;  %v1248_v33 = vld [vmem:[#allocation2 + $0x18c] ss:$24 sps:$4 sm:$0xff]   ;;  %v1251_v35 = vld [vmem:[#allocation2 + $0x188] ss:$24 sps:$4 sm:$0xff]  }
  0x1f   :  { %666 = vmatprep.subr.bf16.mxu1 %v1218_v13  ;;  %v1250_v34 = vld [vmem:[#allocation2 + $0x180] ss:$24 sps:$4 sm:$0xff]   ;;  %v1252_v36 = vld [vmem:[#allocation2 + $0x1b4] ss:$24 sps:$4 sm:$0xff]   ;;  %v1256_v38 = vld [vmem:[#allocation2 + $0x1b0] ss:$24 sps:$4 sm:$0xff]  }
  0x20   :  { %v1254_v37 = vld [vmem:[#allocation2 + $0x1bc] ss:$24 sps:$4 sm:$0xff]   ;;  %v1257_v39 = vld [vmem:[#allocation2 + $0x1b8] ss:$24 sps:$4 sm:$0xff]   ;;  %v1260_v41 = vld [vmem:[#allocation2 + $0x1ec] ss:$24 sps:$4 sm:$0xff]  }
  0x21   :  { %626 = vmatpush1.bf16.msra.mxu0 %v1220_v14  ;;  %v1258_v40 = vld [vmem:[#allocation2 + $0x1e4] ss:$24 sps:$4 sm:$0xff]   ;;  %v1262_v42 = vld [vmem:[#allocation2 + $0x1e0] ss:$24 sps:$4 sm:$0xff]   ;;  %v1264_v44 = vld [vmem:[#allocation2 + $0x214] ss:$24 sps:$4 sm:$0xff]  }
  0x22   :  { %667 = vmatpush1.bf16.msra.mxu1 %v1221_v15  ;;  %627 = vmatprep.subr.bf16.mxu0 %v1222_v16  ;;  %v1263_v43 = vld [vmem:[#allocation2 + $0x1e8] ss:$24 sps:$4 sm:$0xff]   ;;  %v1266_v45 = vld [vmem:[#allocation2 + $0x21c] ss:$24 sps:$4 sm:$0xff]   ;;  %v1269_v49 = vld [vmem:[#allocation2 + $0x218] ss:$24 sps:$4 sm:$0xff]  }
  0x23   :  { %668 = vmatprep.subr.bf16.mxu1 %v1224_v17  ;;  %v35_v46 = vld [vmem:[%s1586_s0] sm:$0xff]  ;;  %v1268_v48 = vld [vmem:[#allocation2 + $0x210] ss:$24 sps:$4 sm:$0xff]   ;;  %v1276_v54 = vld [vmem:[#allocation2 + $0x274] ss:$24 sps:$4 sm:$0xff]   ;;  %v1395_v16 = vmov 0.0  }
  0x24   :  { %v1444_v47 = vcombine.high %v35_v46, %v35_v46  ;;  %v1270_v50 = vld [vmem:[#allocation2 + $0x244] ss:$24 sps:$4 sm:$0xff]   ;;  %v1274_v52 = vld [vmem:[#allocation2 + $0x240] ss:$24 sps:$4 sm:$0xff]   ;;  %v1280_v56 = vld [vmem:[#allocation2 + $0x270] ss:$24 sps:$4 sm:$0xff]   ;;  %v1460_v8 = vcombine.low %v35_v46, %v35_v46 }
  0x25   :  { %628 = vmatpush1.bf16.msra.mxu0 %v1226_v18  ;;  %v1272_v51 = vld [vmem:[#allocation2 + $0x24c] ss:$24 sps:$4 sm:$0xff]   ;;  %v1275_v53 = vld [vmem:[#allocation2 + $0x248] ss:$24 sps:$4 sm:$0xff]   ;;  %v1278_v55 = vld [vmem:[#allocation2 + $0x27c] ss:$24 sps:$4 sm:$0xff]  }
  0x26   :  { %669 = vmatpush1.bf16.msra.mxu1 %v1227_v19  ;;  %629 = vmatprep.subr.bf16.mxu0 %v1228_v20  ;;  %v1281_v57 = vld [vmem:[#allocation2 + $0x278] ss:$24 sps:$4 sm:$0xff]   ;;  %v1282_v58 = vld [vmem:[#allocation2 + $0x2a4] ss:$24 sps:$4 sm:$0xff]   ;;  %v1287_v61 = vld [vmem:[#allocation2 + $0x2a8] ss:$24 sps:$4 sm:$0xff]  }
  0x27   :  { %670 = vmatprep.subr.bf16.mxu1 %v1230_v21  ;;  %651 = vmatprep.mubr.bf16.mxu0 %v1444_v47  ;;  %v1284_v59 = vld [vmem:[#allocation2 + $0x2ac] ss:$24 sps:$4 sm:$0xff]   ;;  %v1286_v60 = vld [vmem:[#allocation2 + $0x2a0] ss:$24 sps:$4 sm:$0xff]   ;;  %v1290_v63 = vld [vmem:[#allocation2 + $0x2dc] ss:$24 sps:$4 sm:$0xff]  }
  0x28   :  { %692 = vmatprep.mubr.bf16.mxu1 %v1444_v47  ;;  %v1288_v62 = vld [vmem:[#allocation2 + $0x2d4] ss:$24 sps:$4 sm:$0xff]   ;;  %v805_v1 = vld [vmem:[%s1589_s3 + $0x18] sm:$0xff]  ;;  %v1292_v2 = vld [vmem:[#allocation2 + $0x2d0] ss:$24 sps:$4 sm:$0xff]   ;;  %vm808_vm0 = vcmask 195584  }
  0x29   :  { %630 = vmatpush1.bf16.msra.mxu0 %v1232_v22  ;;  %v803_v0 = vld [vmem:[%s1589_s3 + $0x8] sm:$0xff]  ;;  %v1293_v3 = vld [vmem:[#allocation2 + $0x2d8] ss:$24 sps:$4 sm:$0xff]   ;;  %v802_v5 = vld [vmem:[%s1589_s3] sm:$0xff] }
  0x2a   :  { %671 = vmatpush1.bf16.msra.mxu1 %v1233_v23  ;;  %631 = vmatprep.subr.bf16.mxu0 %v1234_v24  ;;  %v1298_v4 = vld [vmem:[#allocation2 + $0x14] ss:$24 sps:$4 sm:$0xff]   ;;  %v1187_v6 = vpack.c.bf16 %v805_v1, %v803_v0  ;;  %v1296_v9 = vld [vmem:[#allocation2 + $0x10] ss:$24 sps:$4 sm:$0xff]   ;;  %v1301_v11 = vld [vmem:[#allocation2 + $0x44] ss:$24 sps:$4 sm:$0xff]  }
  0x2b   :  { %672 = vmatprep.subr.bf16.mxu1 %v1236_v25  ;;  %v804_v7 = vld [vmem:[%s1589_s3 + $0x10] sm:$0xff]  ;;  %v807_v12 = vld [vmem:[%s1589_s3 + $0x28] sm:$0xff]  ;;  %v1299_v13 = vld [vmem:[#allocation2 + $0x40] ss:$24 sps:$4 sm:$0xff]  }
  0x2c   :  { %v1189_v10 = vpack.c.bf16 %v804_v7, %v802_v5  ;;  %v806_v14 = vld [vmem:[%s1589_s3 + $0x20] sm:$0xff]  ;;  %v1304_v15 = vld [vmem:[#allocation2 + $0x74] ss:$24 sps:$4 sm:$0xff]   ;;  %v1302_v17 = vld [vmem:[#allocation2 + $0x70] ss:$24 sps:$4 sm:$0xff]  }
  0x2d   :  { %632 = vmatpush1.bf16.msra.mxu0 %v1238_v26  ;;  %v786_v18 = vld [vmem:[%s1590_s4] sm:$0xff]  ;;  %v787_v21 = vld [vmem:[%s1590_s4 + $0x8] sm:$0xff]  ;;  %v788_v24 = vld [vmem:[%s1590_s4 + $0x10] sm:$0xff] }
  0x2e   :  { %673 = vmatpush1.bf16.msra.mxu1 %v1239_v27  ;;  %633 = vmatprep.subr.bf16.mxu0 %v1240_v28  ;;  %v1307_v19 = vld [vmem:[#allocation2 + $0xa4] ss:$24 sps:$4 sm:$0xff]   ;;  %v1305_v20 = vld [vmem:[#allocation2 + $0xa0] ss:$24 sps:$4 sm:$0xff]   ;;  %v1310_v22 = vld [vmem:[#allocation2 + $0xd4] ss:$24 sps:$4 sm:$0xff]  }
  0x2f   :  { %674 = vmatprep.subr.bf16.mxu1 %v1242_v29  ;;  %v1308_v23 = vld [vmem:[#allocation2 + $0xd0] ss:$24 sps:$4 sm:$0xff]   ;;  %v1313_v25 = vld [vmem:[#allocation2 + $0x104] ss:$24 sps:$4 sm:$0xff]   ;;  %v1311_v26 = vld [vmem:[#allocation2 + $0x100] ss:$24 sps:$4 sm:$0xff]  }
  0x30   :  { %v789_v27 = vld [vmem:[%s1590_s4 + $0x18] sm:$0xff]  ;;  %v1316_v28 = vld [vmem:[#allocation2 + $0x134] ss:$24 sps:$4 sm:$0xff]   ;;  %v1314_v29 = vld [vmem:[#allocation2 + $0x130] ss:$24 sps:$4 sm:$0xff]  }
  0x31   :  { %634 = vmatpush1.bf16.msra.mxu0 %v1244_v30  ;;  %v790_v30 = vld [vmem:[%s1590_s4 + $0x20] sm:$0xff]  ;;  %v1334_v46 = vld [vmem:[#allocation2 + $0x254] ss:$24 sps:$4 sm:$0xff]  }
  0x32   :  { %675 = vmatpush1.bf16.msra.mxu1 %v1245_v31  ;;  %635 = vmatprep.subr.bf16.mxu0 %v1246_v32  ;;  %v1319_v31 = vld [vmem:[#allocation2 + $0x164] ss:$24 sps:$4 sm:$0xff]   ;;  %v1317_v32 = vld [vmem:[#allocation2 + $0x160] ss:$24 sps:$4 sm:$0xff]  }
  0x33   :  { %676 = vmatprep.subr.bf16.mxu1 %v1248_v33  ;;  %v791_v33 = vld [vmem:[%s1590_s4 + $0x28] sm:$0xff]  ;;  %v742_v0 = vld [vmem:[%s1588_s2] ss:$4 sm:$0x3] }
  0x35   :  { %636 = vmatpush1.bf16.msra.mxu0 %v1250_v34  ;;  %v1322_v34 = vld [vmem:[#allocation2 + $0x194] ss:$24 sps:$4 sm:$0xff]  }
  0x36   :  { %677 = vmatpush1.bf16.msra.mxu1 %v1251_v35  ;;  %637 = vmatprep.subr.bf16.mxu0 %v1252_v36  ;;  %v1320_v35 = vld [vmem:[#allocation2 + $0x190] ss:$24 sps:$4 sm:$0xff]  }
  0x37   :  { %678 = vmatprep.subr.bf16.mxu1 %v1254_v37  ;;  %v792_v36 = vld [vmem:[%s1590_s4 + $0x30] sm:$0xff]  ;;  %v1325_v37 = vld [vmem:[#allocation2 + $0x1c4] ss:$24 sps:$4 sm:$0xff]  }
  0x39   :  { %638 = vmatpush1.bf16.msra.mxu0 %v1256_v38  ;;  %v1323_v38 = vld [vmem:[#allocation2 + $0x1c0] ss:$24 sps:$4 sm:$0xff]  }
  0x3a   :  { %679 = vmatpush1.bf16.msra.mxu1 %v1257_v39  ;;  %639 = vmatprep.subr.bf16.mxu0 %v1258_v40  ;;  %v793_v39 = vld [vmem:[%s1590_s4 + $0x38] sm:$0xff]  ;;  %v1328_v40 = vld [vmem:[#allocation2 + $0x1f4] ss:$24 sps:$4 sm:$0xff]  }
  0x3b   :  { %680 = vmatprep.subr.bf16.mxu1 %v1260_v41  ;;  %v1326_v41 = vld [vmem:[#allocation2 + $0x1f0] ss:$24 sps:$4 sm:$0xff]  }
  0x3d   :  { %640 = vmatpush1.bf16.msra.mxu0 %v1262_v42  ;;  %v794_v42 = vld [vmem:[%s1590_s4 + $0x40] sm:$0xff] }
  0x3e   :  { %681 = vmatpush1.bf16.msra.mxu1 %v1263_v43  ;;  %641 = vmatprep.subr.bf16.mxu0 %v1264_v44  ;;  %v1331_v43 = vld [vmem:[#allocation2 + $0x224] ss:$24 sps:$4 sm:$0xff]   ;;  %v1329_v44 = vld [vmem:[#allocation2 + $0x220] ss:$24 sps:$4 sm:$0xff]  }
  0x3f   :  { %682 = vmatprep.subr.bf16.mxu1 %v1266_v45  ;;  %v795_v45 = vld [vmem:[%s1590_s4 + $0x48] sm:$0xff] }
  0x41   :  { %642 = vmatpush1.bf16.msra.mxu0 %v1268_v48  ;;  %v796_v48 = vld [vmem:[%s1590_s4 + $0x50] sm:$0xff] }
  0x42   :  { %683 = vmatpush1.bf16.msra.mxu1 %v1269_v49  ;;  %643 = vmatprep.subr.bf16.mxu0 %v1270_v50  ;;  %v1337_v49 = vld [vmem:[#allocation2 + $0x284] ss:$24 sps:$4 sm:$0xff]   ;;  %v1335_v50 = vld [vmem:[#allocation2 + $0x280] ss:$24 sps:$4 sm:$0xff]  }
  0x43   :  { %684 = vmatprep.subr.bf16.mxu1 %v1272_v51  ;;  %v797_v51 = vld [vmem:[%s1590_s4 + $0x58] sm:$0xff] }
  0x45   :  { %644 = vmatpush1.bf16.msra.mxu0 %v1274_v52  ;;  %v1340_v52 = vld [vmem:[#allocation2 + $0x2b4] ss:$24 sps:$4 sm:$0xff]  }
  0x46   :  { %685 = vmatpush1.bf16.msra.mxu1 %v1275_v53  ;;  %645 = vmatprep.subr.bf16.mxu0 %v1276_v54  ;;  %v1338_v53 = vld [vmem:[#allocation2 + $0x2b0] ss:$24 sps:$4 sm:$0xff]   ;;  %v798_v54 = vld [vmem:[%s1590_s4 + $0x60] sm:$0xff] }
  0x47   :  { %686 = vmatprep.subr.bf16.mxu1 %v1278_v55  ;;  %v1343_v55 = vld [vmem:[#allocation2 + $0x2e4] ss:$24 sps:$4 sm:$0xff]  }
  0x49   :  { %646 = vmatpush1.bf16.msra.mxu0 %v1280_v56  ;;  %v1341_v56 = vld [vmem:[#allocation2 + $0x2e0] ss:$24 sps:$4 sm:$0xff]  }
  0x4a   :  { %687 = vmatpush1.bf16.msra.mxu1 %v1281_v57  ;;  %647 = vmatprep.subr.bf16.mxu0 %v1282_v58  ;;  %v799_v57 = vld [vmem:[%s1590_s4 + $0x68] sm:$0xff]  ;;  %v800_v58 = vld [vmem:[%s1590_s4 + $0x70] sm:$0xff] }
  0x4b   :  { %688 = vmatprep.subr.bf16.mxu1 %v1284_v59  ;;  %v801_v59 = vld [vmem:[%s1590_s4 + $0x78] sm:$0xff] }
  0x4d   :  { %648 = vmatpush1.bf16.msra.mxu0 %v1286_v60  ;;  %v744_v60 = vlaneseq }
  0x4e   :  { %689 = vmatpush1.bf16.msra.mxu1 %v1287_v61  ;;  %649 = vmatprep.subr.bf16.mxu0 %v1288_v62 }
  0x4f   :  { %690 = vmatprep.subr.bf16.mxu1 %v1290_v63  ;;  %v745_v61 = vshrl.u32 %v744_v60, 7 }
  0x51   :  { %650 = vmatpush1.bf16.msra.mxu0 %v1292_v2  ;;  %v1552_v62 = vsub.s32 0, %v745_v61  ;;  %v1557_v1 = vsub.s32 1, %v745_v61 }
  0x52   :  { %691 = vmatpush1.bf16.msra.mxu1 %v1293_v3  ;;  %701 = vmatprep.subr.bf16.mxu0 %v1298_v4 }
  0x53   :  { %1188 = vmatprep.subr.bf16.mxu1 %v1187_v6  ;;  %v747_v7 = vrot.slane %v742_v0, %v1552_v62 }
  0x54   :  { %652 = vmatmul.mubr.bf16.vlgmr.msra.gmra.mrb[0].mxu0 %v1460_v8 }
  0x55   :  { %693 = vmatmul.mubr.bf16.vlgmr.msra.gmra.mrb[0].mxu1 %v1460_v8  ;;  %702 = vmatpush1.bf16.msra.mxu0 %v1296_v9 }
  0x56   :  { %1190 = vmatpush1.bf16.msra.mxu1 %v1189_v10  ;;  %703 = vmatprep.subr.bf16.mxu0 %v1301_v11  ;;  %v751_v10 = vrot.slane %v742_v0, %v1557_v1  ;;  %v1169_v11 = vld [vmem:[%s1588_s2 + $0x1] ss:$4 sm:$0x3] }
  0x57   :  { %861 = vmatprep.subr.mxu1 %v807_v12  ;;  %921 = vmatprep.mubr.f32.mxu1 %v1395_v16 }
  0x58   :  { %733 = vmatprep.mubr.bf16.mxu0 %v1444_v47  ;;  %v1332_v47 = vld [vmem:[#allocation2 + $0x250] ss:$24 sps:$4 sm:$0xff]  }
  0x59   :  { %704 = vmatpush1.bf16.msra.mxu0 %v1299_v13  ;;  %v762_v13 = vrot.slane %v1169_v11, %v1552_v62 }
  0x5a   :  { %862 = vmatpush1.msra.mxu1 %v806_v14  ;;  %705 = vmatprep.subr.bf16.mxu0 %v1304_v15  ;;  %v766_v15 = vrot.slane %v1169_v11, %v1557_v1 }
  0x5d   :  { %1171 = vmatmul.mubr.msk.f32.vlgmr.msra.gmra.mrb[4].mxu1 %vm808_vm0, %v786_v18  ;;  %706 = vmatpush1.bf16.msra.mxu0 %v1302_v17 }
  0x5e   :  { %927 = vmatprep.mubr.f32.mxu1 %v1395_v16  ;;  %707 = vmatprep.subr.bf16.mxu0 %v1307_v19 }
  0x61   :  { %1172 = vmatmul.mubr.msk.f32.gmra.mrb[6].mxu1 %vm808_vm0, %v787_v21  ;;  %708 = vmatpush1.bf16.msra.mxu0 %v1305_v20 }
  0x62   :  { %933 = vmatprep.mubr.f32.mxu1 %v1395_v16  ;;  %709 = vmatprep.subr.bf16.mxu0 %v1310_v22 }
  0x65   :  { %1173 = vmatmul.mubr.msk.f32.gmra.mrb[8].mxu1 %vm808_vm0, %v788_v24  ;;  %710 = vmatpush1.bf16.msra.mxu0 %v1308_v23 }
  0x66   :  { %939 = vmatprep.mubr.f32.mxu1 %v1395_v16  ;;  %711 = vmatprep.subr.bf16.mxu0 %v1313_v25 }
  0x69   :  { %1174 = vmatmul.mubr.msk.f32.gmra.mrb[10].mxu1 %vm808_vm0, %v789_v27  ;;  %712 = vmatpush1.bf16.msra.mxu0 %v1311_v26 }
  0x6a   :  { %945 = vmatprep.mubr.f32.mxu1 %v1395_v16  ;;  %713 = vmatprep.subr.bf16.mxu0 %v1316_v28 }
  0x6d   :  { %1175 = vmatmul.mubr.msk.f32.gmra.mrb[12].mxu1 %vm808_vm0, %v790_v30  ;;  %714 = vmatpush1.bf16.msra.mxu0 %v1314_v29 }
  0x6e   :  { %951 = vmatprep.mubr.f32.mxu1 %v1395_v16  ;;  %715 = vmatprep.subr.bf16.mxu0 %v1319_v31 }
  0x71   :  { %1176 = vmatmul.mubr.msk.f32.gmra.mrb[14].mxu1 %vm808_vm0, %v791_v33  ;;  %716 = vmatpush1.bf16.msra.mxu0 %v1317_v32 }
  0x72   :  { %957 = vmatprep.mubr.f32.mxu1 %v1395_v16  ;;  %717 = vmatprep.subr.bf16.mxu0 %v1322_v34 }
  0x75   :  { %1177 = vmatmul.mubr.msk.f32.gmra.mrb[16].mxu1 %vm808_vm0, %v792_v36  ;;  %718 = vmatpush1.bf16.msra.mxu0 %v1320_v35 }
  0x76   :  { %963 = vmatprep.mubr.f32.mxu1 %v1395_v16  ;;  %719 = vmatprep.subr.bf16.mxu0 %v1325_v37 }
  0x79   :  { %1178 = vmatmul.mubr.msk.f32.gmra.mrb[18].mxu1 %vm808_vm0, %v793_v39  ;;  %720 = vmatpush1.bf16.msra.mxu0 %v1323_v38 }
  0x7a   :  { %969 = vmatprep.mubr.f32.mxu1 %v1395_v16  ;;  %721 = vmatprep.subr.bf16.mxu0 %v1328_v40 }
  0x7d   :  { %1179 = vmatmul.mubr.msk.f32.gmra.mrb[20].mxu1 %vm808_vm0, %v794_v42  ;;  %722 = vmatpush1.bf16.msra.mxu0 %v1326_v41 }
  0x7e   :  { %975 = vmatprep.mubr.f32.mxu1 %v1395_v16  ;;  %723 = vmatprep.subr.bf16.mxu0 %v1331_v43 }
  0x81   :  { %1180 = vmatmul.mubr.msk.f32.gmra.mrb[22].mxu1 %vm808_vm0, %v795_v45  ;;  %724 = vmatpush1.bf16.msra.mxu0 %v1329_v44 }
  0x82   :  { %981 = vmatprep.mubr.f32.mxu1 %v1395_v16  ;;  %725 = vmatprep.subr.bf16.mxu0 %v1334_v46 }
  0x85   :  { %1181 = vmatmul.mubr.msk.f32.gmra.mrb[24].mxu1 %vm808_vm0, %v796_v48  ;;  %726 = vmatpush1.bf16.msra.mxu0 %v1332_v47 }
  0x86   :  { %987 = vmatprep.mubr.f32.mxu1 %v1395_v16  ;;  %727 = vmatprep.subr.bf16.mxu0 %v1337_v49 }
  0x89   :  { %1182 = vmatmul.mubr.msk.f32.gmra.mrb[26].mxu1 %vm808_vm0, %v797_v51  ;;  %728 = vmatpush1.bf16.msra.mxu0 %v1335_v50 }
  0x8a   :  { %993 = vmatprep.mubr.f32.mxu1 %v1395_v16  ;;  %729 = vmatprep.subr.bf16.mxu0 %v1340_v52 }
  0x8d   :  { %1183 = vmatmul.mubr.msk.f32.gmra.mrb[28].mxu1 %vm808_vm0, %v798_v54  ;;  %730 = vmatpush1.bf16.msra.mxu0 %v1338_v53 }
  0x8e   :  { %997 = vmatprep.mubr.f32.mxu1 %v1395_v16  ;;  %731 = vmatprep.subr.bf16.mxu0 %v1343_v55 }
  0x91   :  { %1184 = vmatmul.mubr.msk.f32.gmra.mrb[30].mxu1 %vm808_vm0, %v799_v57  ;;  %732 = vmatpush1.bf16.msra.mxu0 %v1341_v56 }
  0x92   :  { %1001 = vmatprep.mubr.f32.mxu1 %v1395_v16 }
  0x94   :  { %734 = vmatmul.mubr.bf16.vlgmr.msra.gmra.mrb[4].mxu0 %v1460_v8 }
  0x95   :  { %1185 = vmatmul.mubr.msk.f32.gmra.mrb[32].mxu1 %vm808_vm0, %v800_v58 }
  0x96   :  { %1005 = vmatprep.mubr.f32.mxu1 %v1395_v16 }
  0x99   :  { %1186 = vmatmul.mubr.msk.f32.gmra.mrb[34].mxu1 %vm808_vm0, %v801_v59 }
 0x127   :  { %v653_v63 = vpop.f32.mrb[0].mxu0 }
 0x128   :  { %v694_v2 = vpop.f32.mrb[0].mxu1  ;;  %v655_v3 = vpop.f32.mrb[1].mxu0  ;;  %v754_v12 = vadd.f32 %v747_v7, %v653_v63  ;;  %v1170_v63 = vld [vmem:[%s1588_s2 + $0x2] ss:$4 sm:$0x3]  ;;  %s1396_s2 = smov [#allocation5]  }
 0x129   :  { %v696_v4 = vpop.f32.mrb[1].mxu1  ;;  %v657_v5 = vpop.f32.mrb[2].mxu0  ;;  %v755_v14 = vadd.f32 %v751_v10, %v655_v3  ;;  %v769_v20 = vadd.f32 %v762_v13, %v694_v2  ;;  %v777_v2 = vrot.slane %v1170_v63, %v1552_v62  ;;  %s1059_s27 = sshll.u32 %s1396_s2, 4  ;;  %s1060_s27 = int_to_ptr.vmem [resolvable:$true] %s1059_s27 }
 0x12a   :  { %v698_v6 = vpop.f32.mrb[2].mxu1  ;;  %v658_v8 = vpop.f32.mrb[3].mxu0  ;;  %v770_v21 = vadd.f32 %v766_v15, %v696_v4  ;;  %v781_v4 = vrot.slane %v1170_v63, %v1557_v1  ;;  %s1366_s28 = scalar_lea.vmem %s1060_s27, 768  ;;  %p1371_p9 = scmp.lt.s32.totalorder %s1060_s27, %s1060_s27 }
 0x12b   :  { %v699_v9 = vpop.f32.mrb[3].mxu1  ;;  %p1367_p8 = scmp.ne.s32.totalorder %s1060_s27, %s1366_s28  ;;  %p1372_p10 = scmp.lt.s32.totalorder %s1366_s28, %s1366_s28 }
 0x12d   :  { %p1373_p11 = por %p1372_p10, %p1371_p9 }
 0x12f   :  { %p1374_p12 = pnand %p1373_p11, %p1367_p8 }
 0x130   :  { %v923_v16 = vpop.f32.mrb[4].mxu1 }
 0x131   :  { %v1010_v17 = vmul.f32 %v923_v16, %v754_v12  ;;  %v925_v18 = vpop.f32.mrb[5].mxu1 }
 0x132   :  { %v1011_v19 = vmul.f32 %v925_v18, %v755_v14 }
 0x134   :  { %v929_v22 = vpop.f32.mrb[6].mxu1 }
 0x135   :  { %v1012_v23 = vmul.f32 %v929_v22, %v769_v20  ;;  %v931_v24 = vpop.f32.mrb[7].mxu1 }
 0x136   :  { %v1013_v25 = vmul.f32 %v931_v24, %v770_v21 }
 0x137   :  { %v1014_v26 = vadd.f32 %v1012_v23, %v1010_v17 }
 0x138   :  { %v1015_v27 = vadd.f32 %v1013_v25, %v1011_v19  ;;  %v935_v28 = vpop.f32.mrb[8].mxu1 }
 0x139   :  { %v937_v29 = vpop.f32.mrb[9].mxu1 }
 0x13c   :  { %v941_v30 = vpop.f32.mrb[10].mxu1 }
 0x13d   :  { %v1566_v31 = vpop.f32.mrb[11].mxu1 }
 0x140   :  { %v947_v32 = vpop.f32.mrb[12].mxu1 }
 0x141   :  { %v1024_v33 = vmul.f32 %v947_v32, %v754_v12  ;;  %v949_v34 = vpop.f32.mrb[13].mxu1 }
 0x142   :  { %v1025_v35 = vmul.f32 %v949_v34, %v755_v14 }
 0x144   :  { %v953_v36 = vpop.f32.mrb[14].mxu1 }
 0x145   :  { %v1026_v37 = vmul.f32 %v953_v36, %v769_v20  ;;  %v955_v38 = vpop.f32.mrb[15].mxu1 }
 0x146   :  { %v1027_v39 = vmul.f32 %v955_v38, %v770_v21 }
 0x147   :  { %v1028_v40 = vadd.f32 %v1026_v37, %v1024_v33 }
 0x148   :  { %v1029_v41 = vadd.f32 %v1027_v39, %v1025_v35  ;;  %v959_v42 = vpop.f32.mrb[16].mxu1 }
 0x149   :  { %v961_v43 = vpop.f32.mrb[17].mxu1 }
 0x14c   :  { %v965_v44 = vpop.f32.mrb[18].mxu1 }
 0x14d   :  { %v967_v45 = vpop.f32.mrb[19].mxu1 }
 0x150   :  { %v971_v46 = vpop.f32.mrb[20].mxu1 }
 0x151   :  { %v1039_v47 = vmul.f32 %v971_v46, %v754_v12  ;;  %v973_v48 = vpop.f32.mrb[21].mxu1 }
 0x152   :  { %v1040_v49 = vmul.f32 %v973_v48, %v755_v14 }
 0x154   :  { %v977_v50 = vpop.f32.mrb[22].mxu1 }
 0x155   :  { %v1041_v51 = vmul.f32 %v977_v50, %v769_v20  ;;  %v979_v52 = vpop.f32.mrb[23].mxu1 }
 0x156   :  { %v1042_v53 = vmul.f32 %v979_v52, %v770_v21 }
 0x157   :  { %v1043_v54 = vadd.f32 %v1041_v51, %v1039_v47 }
 0x158   :  { %v1044_v55 = vadd.f32 %v1042_v53, %v1040_v49  ;;  %v983_v56 = vpop.f32.mrb[24].mxu1 }
 0x159   :  { %v985_v57 = vpop.f32.mrb[25].mxu1 }
 0x15c   :  { %v989_v58 = vpop.f32.mrb[26].mxu1 }
 0x15d   :  { %v991_v59 = vpop.f32.mrb[27].mxu1 }
 0x160   :  { %v995_v60 = vpop.f32.mrb[28].mxu1 }
 0x161   :  { %v996_v61 = vpop.f32.mrb[29].mxu1 }
 0x164   :  { %v999_v0 = vpop.f32.mrb[30].mxu1 }
 0x165   :  { %v1000_v3 = vpop.f32.mrb[31].mxu1 }
 0x167   :  { %v735_v5 = vpop.f32.mrb[4].mxu0 }
 0x168   :  { %v1003_v6 = vpop.f32.mrb[32].mxu1  ;;  %v784_v7 = vadd.f32 %v777_v2, %v735_v5  ;;  %v737_v8 = vpop.f32.mrb[5].mxu0 }
 0x169   :  { %v1004_v9 = vpop.f32.mrb[33].mxu1  ;;  %v785_v10 = vadd.f32 %v781_v4, %v737_v8  ;;  %v739_v11 = vpop.f32.mrb[6].mxu0 }
 0x16a   :  { %v1016_v12 = vmul.f32 %v935_v28, %v784_v7  ;;  %v1030_v13 = vmul.f32 %v959_v42, %v784_v7  ;;  %v1045_v14 = vmul.f32 %v983_v56, %v784_v7  ;;  %v740_v15 = vpop.f32.mrb[7].mxu0 }
 0x16b   :  { %v1017_v16 = vmul.f32 %v937_v29, %v785_v10  ;;  %v1031_v17 = vmul.f32 %v961_v43, %v785_v10  ;;  %v1046_v18 = vmul.f32 %v985_v57, %v785_v10 }
 0x16c   :  { %v1007_v19 = vpop.f32.mrb[34].mxu1  ;;  %v1018_v62 = vadd.f32 %v1016_v12, %v1014_v26  ;;  %v1032_v20 = vadd.f32 %v1030_v13, %v1028_v40  ;;  %v1047_v1 = vadd.f32 %v1045_v14, %v1043_v54 }
 0x16d   :  { %v1008_v21 = vpop.f32.mrb[35].mxu1  ;;  %v1019_v22 = vadd.f32 %v1017_v16, %v1015_v27  ;;  %v1033_v23 = vadd.f32 %v1031_v17, %v1029_v41  ;;  %v1048_v24 = vadd.f32 %v1046_v18, %v1044_v55 }
 0x16e   :  { %v1020_v25 = vadd.f32 %v1018_v62, %v941_v30  ;;  %v1034_v32 = vadd.f32 %v1032_v20, %v965_v44  ;;  %v1049_v33 = vadd.f32 %v1047_v1, %v989_v58 }
 0x16f   :  { %v1021_v28 = vadd.f32 %v1019_v22, %v1566_v31  ;;  %v1035_v34 = vadd.f32 %v1033_v23, %v967_v45  ;;  %v1050_v29 = vadd.f32 %v1048_v24, %v991_v59 }
 0x170   :  { %1022 = vst [vmem:[#allocation5] sm:$0xff] %v1020_v25  ;;  %1037 = vst [vmem:[#allocation5 + $0x10] sm:$0xff] %v1034_v32 }
 0x171   :  { %1052 = vst [vmem:[#allocation5 + $0x20] sm:$0xff] %v1049_v33  ;;  %1023 = vst [vmem:[#allocation5 + $0x8] sm:$0xff] %v1021_v28 }
 0x172   :  { %1038 = vst [vmem:[#allocation5 + $0x18] sm:$0xff] %v1035_v34  ;;  %1053 = vst [vmem:[#allocation5 + $0x28] sm:$0xff] %v1050_v29 }
 0x173   :  { %1377 = shalt.err (!%p1374_p12)
}
 0x174   :  { %s1378_s6 = scalar_lea.hbm %s1591_s5, 768 }
 0x175   :  { %p1379_p13 = scmp.ne.s32.totalorder %s1591_s5, %s1378_s6  ;;  %p1382_p0 = scmp.lt.u32.totalorder %s1378_s6, %s1591_s5 }
 0x177   :  { %p1384_p1 = pnand %p1382_p0, %p1379_p13 }
 0x179   :  { %1387 = shalt.err (!%p1384_p1)
}
 0x17a   :  { %s1397_s9 = smov 256   ;;  %s1398_s10 = smov 16  }
 0x17b   :  { %1065 = dma.vmem_to_hbm [thread:$0]  %s1060_s27, 768, %s1591_s5, [#allocation4], %s1397_s9, %s1397_s9, %s1398_s10  }
 0x17c   :  { %1390 = dma.done.wait [#allocation4], 768  }
 0x17d   :  { %1391 = vsyncadd [#allocation4], 4294966528 }
 0x17e   :  { %1069 = vsyncpa [#allocation3], 1 }
 0x17f   :  { %1070 = vsyncpa [#allocation4], 1 }

</bundles_post_ra>
